<compile_context>
chip_gen: v7x
topology: tpu7x:2x2x1
jax: 0.10.0
libtpu: 0.0.40
codegen_flags: <defaults>
</compile_context>

<pallas_src>
import numpy as np
import jax
import jax.numpy as jnp
from jax import lax
from jax.experimental import pallas as pl
from jax.experimental.pallas import tpu as pltpu

WINDOWS = (2, 3, 4)          # conv window sizes (kernel heights)
CHANNELS = (4, 4, 8)         # output channels per window
CLASSES = 3


def _round_up(x, m):
    return ((x + m - 1) // m) * m


def sentence_cnn_kernel(ids_ref, emb_ref, wp_ref, bp_ref, mask_ref,
                        wl_ref, bl_ref, out_ref):
    BLp = ids_ref.shape[0]               # B * L_pad
    V, D = emb_ref.shape
    SD, F = wp_ref.shape                 # (S*D, sum(C))
    BT = mask_ref.shape[0]               # B * T_cols
    B = out_ref.shape[0]
    L_pad = BLp // B
    T_cols = BT // B
    S = SD // D

    # --- 1) embedding lookup as a one-hot matmul (bf16 MXU inputs, f32 acc) ---
    iota_v = lax.broadcasted_iota(jnp.int32, (BLp, V), 1)
    onehot = (ids_ref[...] == iota_v).astype(jnp.bfloat16)        # exact in bf16
    x = jnp.dot(onehot, emb_ref[...],
                preferred_element_type=jnp.float32)               # (B*L_pad, D)
    x = x.astype(jnp.bfloat16).reshape(B, L_pad, D)               # layout-preserving

    # --- 2) im2col: pack S consecutive rows along lanes -> K = S*D = 128 ---
    cols = jnp.concatenate([x[:, i:i + T_cols, :] for i in range(S)],
                           axis=2)                                # (B, T_cols, S*D)
    cols2 = cols.reshape(B * T_cols, SD)                          # layout-preserving

    # --- 3) single packed conv matmul + bias + validity mask + ReLU + max ---
    scores = jnp.dot(cols2, wp_ref[...],
                     preferred_element_type=jnp.float32)          # (B*T_cols, F)
    scores = scores + bp_ref[...] + mask_ref[...]
    relu = jnp.maximum(scores, 0.0).reshape(B, T_cols, F)
    feat = jnp.max(relu, axis=1)                                  # (B, F)

    # --- 4) final linear on the VPU/XLU (tiny contraction; no MXU push) ---
    logits = jnp.sum(feat[:, None, :] * wl_ref[...][None, :, :], axis=2)
    out_ref[...] = logits + bl_ref[...]                           # (B, classes)


def sentence_cnn(ids, emb, conv_ws, conv_bs, wl, bl):
    B, L = ids.shape
    V, D = emb.shape
    S = max(WINDOWS)
    F = sum(CHANNELS)

    # Round padded lengths to multiples of 16 (bf16 sublane tile) so in-kernel
    # leading-dim reshapes are layout preserving.
    L_pad = _round_up(L + S - 1, 16)
    T_cols = _round_up(L - min(WINDOWS) + 1, 16)
    assert T_cols + S - 1 <= L_pad

    # Padded ids (pad value is irrelevant: padded rows either multiply a
    # zero-padded filter row or land on a masked position).
    ids_pad = jnp.zeros((B, L_pad), jnp.int32).at[:, :L].set(ids)
    ids_col = ids_pad.reshape(B * L_pad, 1)

    emb_bf16 = emb.astype(jnp.bfloat16)

    # Pack all conv filters into one (S*D, F) matrix (zero-pad short windows).
    w_blocks = []
    for w, s in zip(conv_ws, WINDOWS):
        C = w.shape[0]
        w_blocks.append(jnp.zeros((C, S, D), jnp.float32).at[:, :s, :].set(w))
    w_packed = (jnp.concatenate(w_blocks, axis=0)           # (F, S, D)
                .reshape(F, S * D).T.astype(jnp.bfloat16))  # (S*D, F)
    bias_packed = jnp.concatenate(conv_bs).reshape(1, F).astype(jnp.float32)

    # Additive validity mask: -1e30 at window positions past each window's
    # valid range (and the padded tail), so they can never win the max.
    mask_np = np.zeros((B, T_cols, F), np.float32)
    c0 = 0
    for s, c in zip(WINDOWS, CHANNELS):
        mask_np[:, L - s + 1:, c0:c0 + c] = -1e30
        c0 += c
    mask = jnp.asarray(mask_np.reshape(B * T_cols, F))

    wl2 = wl.astype(jnp.float32)
    bl2 = bl.reshape(1, -1).astype(jnp.float32)

    args = (ids_col, emb_bf16, w_packed, bias_packed, mask, wl2, bl2)

    flops = (2 * B * L_pad * V * D          # embedding one-hot matmul
             + 2 * B * T_cols * S * D * F   # packed im2col conv matmul
             + 2 * B * F * CLASSES)         # final linear
    bytes_accessed = sum(int(np.prod(a.shape)) * a.dtype.itemsize
                         for a in args) + B * CLASSES * 4

    vmem = pl.BlockSpec(memory_space=pltpu.MemorySpace.VMEM)
    return pl.pallas_call(
        sentence_cnn_kernel,
        out_shape=jax.ShapeDtypeStruct((B, CLASSES), jnp.float32),
        in_specs=[vmem] * len(args),
        out_specs=vmem,
        cost_estimate=pl.CostEstimate(flops=flops, transcendentals=0,
                                      bytes_accessed=bytes_accessed),
    )(*args)


def ref_forward(ids, emb, conv_ws, conv_bs, wl, bl):
    """Pure-JAX f32 reference of the intended forward pass."""
    x = emb[ids]                                                  # (B, L, D)
    B, L, D = x.shape
    feats = []
    for s, w, b in zip(WINDOWS, conv_ws, conv_bs):
        T = L - s + 1
        cols = jnp.stack([x[:, i:i + T, :] for i in range(s)], axis=2)
        cols = cols.reshape(B, T, s * D)                          # im2col
        sc = cols @ w.reshape(w.shape[0], -1).T + b               # (B, T, C)
        feats.append(jnp.max(jax.nn.relu(sc), axis=1))
    feat = jnp.concatenate(feats, axis=1)
    return feat @ wl.T + bl


if __name__ == "__main__":
    key = jax.random.PRNGKey(0)
    V, D = 50, 32          # word_num, dimension
    B, L = 2, 16           # batch, sentence length

    keys = jax.random.split(key, 3 + len(WINDOWS))
    k_emb, k_ids, k_lin = keys[0], keys[1], keys[2]
    k_ws = keys[3:]

    # deterministic "pretrained" embedding table
    emb = jax.random.normal(k_emb, (V, D), jnp.float32) * 0.1
    ids = jax.random.randint(k_ids, (B, L), 0, V, dtype=jnp.int32)

    # conv filters: kaiming_normal fan_out, zero bias
    conv_ws, conv_bs = [], []
    for kw, s, c in zip(k_ws, WINDOWS, CHANNELS):
        fan_out = c * s * D
        std = float(np.sqrt(2.0 / fan_out))
        conv_ws.append(jax.random.normal(kw, (c, s, D), jnp.float32) * std)
        conv_bs.append(jnp.zeros((c,), jnp.float32))

    # linear: kaiming_normal fan_out (= classes), zero bias
    F = sum(CHANNELS)
    wl = jax.random.normal(k_lin, (CLASSES, F), jnp.float32) * float(
        np.sqrt(2.0 / CLASSES))
    bl = jnp.zeros((CLASSES,), jnp.float32)

    out = sentence_cnn(ids, emb, conv_ws, conv_bs, wl, bl)
    out = jax.block_until_ready(out)

    ref = ref_forward(ids, emb, conv_ws, conv_bs, wl, bl)
    assert out.shape == (B, CLASSES)
    # bf16 MXU inputs with f32 accumulation -> relaxed tolerance vs f32 ref.
    assert np.allclose(np.asarray(out), np.asarray(ref), atol=2e-2, rtol=2e-2)

    print("KERNEL_OK")
</pallas_src>

<mosaic_0001>
module attributes {stable_mosaic.version = 11 : i64} {
  func.func @sentence_cnn_kernel(%arg0: memref<64x1xi32, #tpu.memory_space<vmem>>, %arg1: memref<50x32xbf16, #tpu.memory_space<vmem>>, %arg2: memref<128x16xbf16, #tpu.memory_space<vmem>>, %arg3: memref<1x16xf32, #tpu.memory_space<vmem>>, %arg4: memref<32x16xf32, #tpu.memory_space<vmem>>, %arg5: memref<3x16xf32, #tpu.memory_space<vmem>>, %arg6: memref<1x3xf32, #tpu.memory_space<vmem>>, %arg7: memref<2x3xf32, #tpu.memory_space<vmem>>) attributes {dimension_semantics = [], scalar_prefetch = 0 : i64, scratch_operands = 0 : i64, tpu.core_type = #tpu.core_type<tc>} {
    %0 = tpu.iota {dimensions = array<i32: 1>} : vector<64x50xi32>
    %c0 = arith.constant 0 : index
    %c0_0 = arith.constant 0 : index
    %1 = vector.load %arg0[%c0, %c0_0] : memref<64x1xi32, #tpu.memory_space<vmem>>, vector<64x1xi32>
    %2 = vector.broadcast %1 : vector<64x1xi32> to vector<64x50xi32>
    %3 = arith.cmpi eq, %2, %0 : vector<64x50xi32>
    %4 = arith.extui %3 : vector<64x50xi1> to vector<64x50xi32>
    %5 = arith.sitofp %4 : vector<64x50xi32> to vector<64x50xf32>
    %6 = arith.truncf %5 : vector<64x50xf32> to vector<64x50xbf16>
    %c0_1 = arith.constant 0 : index
    %c0_2 = arith.constant 0 : index
    %7 = vector.load %arg1[%c0_1, %c0_2] : memref<50x32xbf16, #tpu.memory_space<vmem>>, vector<50x32xbf16>
    %cst = arith.constant dense<0.000000e+00> : vector<64x32xf32>
    %8 = tpu.matmul %6, %7, %cst {dimension_numbers = #tpu.dot_dimension_numbers<[1], [0], [0], [1], [0, 0, 1, 1], [], []>} : vector<64x50xbf16>, vector<50x32xbf16>, vector<64x32xf32> -> vector<64x32xf32>
    %9 = arith.truncf %8 : vector<64x32xf32> to vector<64x32xbf16>
    %10 = vector.shape_cast %9 : vector<64x32xbf16> to vector<2x32x32xbf16>
    %11 = vector.extract_strided_slice %10 {offsets = [0, 0, 0], sizes = [2, 16, 32], strides = [1, 1, 1]} : vector<2x32x32xbf16> to vector<2x16x32xbf16>
    %12 = vector.extract_strided_slice %10 {offsets = [0, 1, 0], sizes = [2, 16, 32], strides = [1, 1, 1]} : vector<2x32x32xbf16> to vector<2x16x32xbf16>
    %13 = vector.extract_strided_slice %10 {offsets = [0, 2, 0], sizes = [2, 16, 32], strides = [1, 1, 1]} : vector<2x32x32xbf16> to vector<2x16x32xbf16>
    %14 = vector.extract_strided_slice %10 {offsets = [0, 3, 0], sizes = [2, 16, 32], strides = [1, 1, 1]} : vector<2x32x32xbf16> to vector<2x16x32xbf16>
    %15 = tpu.concatenate %11, %12, %13, %14 in 2 : vector<2x16x32xbf16>, vector<2x16x32xbf16>, vector<2x16x32xbf16>, vector<2x16x32xbf16> -> vector<2x16x128xbf16>
    %16 = vector.shape_cast %15 : vector<2x16x128xbf16> to vector<32x128xbf16>
    %c0_3 = arith.constant 0 : index
    %c0_4 = arith.constant 0 : index
    %17 = vector.load %arg2[%c0_3, %c0_4] : memref<128x16xbf16, #tpu.memory_space<vmem>>, vector<128x16xbf16>
    %cst_5 = arith.constant dense<0.000000e+00> : vector<32x16xf32>
    %18 = tpu.matmul %16, %17, %cst_5 {dimension_numbers = #tpu.dot_dimension_numbers<[1], [0], [0], [1], [0, 0, 1, 1], [], []>} : vector<32x128xbf16>, vector<128x16xbf16>, vector<32x16xf32> -> vector<32x16xf32>
    %c0_6 = arith.constant 0 : index
    %c0_7 = arith.constant 0 : index
    %19 = vector.load %arg3[%c0_6, %c0_7] : memref<1x16xf32, #tpu.memory_space<vmem>>, vector<1x16xf32>
    %20 = vector.broadcast %19 : vector<1x16xf32> to vector<32x16xf32>
    %21 = arith.addf %18, %20 : vector<32x16xf32>
    %c0_8 = arith.constant 0 : index
    %c0_9 = arith.constant 0 : index
    %22 = vector.load %arg4[%c0_8, %c0_9] : memref<32x16xf32, #tpu.memory_space<vmem>>, vector<32x16xf32>
    %23 = arith.addf %21, %22 : vector<32x16xf32>
    %cst_10 = arith.constant 0.000000e+00 : f32
    %24 = vector.broadcast %cst_10 : f32 to vector<32x16xf32>
    %25 = arith.maximumf %23, %24 : vector<32x16xf32>
    %26 = vector.shape_cast %25 : vector<32x16xf32> to vector<2x16x16xf32>
    %cst_11 = arith.constant dense<0xFF800000> : vector<2x16xf32>
    %27 = vector.multi_reduction <maximumf>, %26, %cst_11 [1] : vector<2x16x16xf32> to vector<2x16xf32>
    %28 = vector.shape_cast %27 : vector<2x16xf32> to vector<2x1x16xf32>
    %c0_12 = arith.constant 0 : index
    %c0_13 = arith.constant 0 : index
    %29 = vector.load %arg5[%c0_12, %c0_13] : memref<3x16xf32, #tpu.memory_space<vmem>>, vector<3x16xf32>
    %30 = vector.shape_cast %29 : vector<3x16xf32> to vector<1x3x16xf32>
    %31 = vector.broadcast %28 : vector<2x1x16xf32> to vector<2x3x16xf32>
    %32 = vector.broadcast %30 : vector<1x3x16xf32> to vector<2x3x16xf32>
    %33 = arith.mulf %31, %32 : vector<2x3x16xf32>
    %cst_14 = arith.constant dense<0.000000e+00> : vector<2x3xf32>
    %34 = vector.multi_reduction <add>, %33, %cst_14 [2] : vector<2x3x16xf32> to vector<2x3xf32>
    %c0_15 = arith.constant 0 : index
    %c0_16 = arith.constant 0 : index
    %35 = vector.load %arg6[%c0_15, %c0_16] : memref<1x3xf32, #tpu.memory_space<vmem>>, vector<1x3xf32>
    %36 = vector.broadcast %35 : vector<1x3xf32> to vector<2x3xf32>
    %37 = arith.addf %34, %36 : vector<2x3xf32>
    %c0_17 = arith.constant 0 : index
    %c0_18 = arith.constant 0 : index
    %38 = vector.load %arg7[%c0_17, %c0_18] : memref<2x3xf32, #tpu.memory_space<vmem>>, vector<2x3xf32>
    tpu.vector_store %arg7[%c0_17, %c0_18], %37 {strides = array<i32>} : memref<2x3xf32, #tpu.memory_space<vmem>>, vector<2x3xf32>,
    return
  }
}

</mosaic_0001>

<bundles_post_ra>
// kernel: tpu_custom_call.1
= control target key start
LH: loop header
LB: loop body
LE: loop exit
PB: predicated region body
PF: predicated region fallthrough
CT: control target
= control target key end

     0   :  { %v621_v2 = vmov 0   ;;  %s791_s0 = inlined_call_operand.vmem [shape: s32[64,1], index: 0, kind: input, shape index: {}]   ;;  %s792_s1 = inlined_call_operand.vmem [shape: bf16[50,32], index: 1, kind: input, shape index: {}]   ;;  %s793_s2 = inlined_call_operand.vmem [shape: bf16[128,16], index: 2, kind: input, shape index: {}]   ;;  %s794_s3 = inlined_call_operand.vmem [shape: f32[1,16], index: 3, kind: input, shape index: {}]   ;;  %s795_s4 = inlined_call_operand.vmem [shape: f32[32,16], index: 4, kind: input, shape index: {}]   ;;  %s796_s5 = inlined_call_operand.vmem [shape: f32[3,16], index: 5, kind: input, shape index: {}]   ;;  %s797_s6 = inlined_call_operand.vmem [shape: f32[1,3], index: 6, kind: input, shape index: {}]   ;;  %s798_s7 = inlined_call_operand.hbm [shape: f32[2,3], index: 7, kind: output, shape index: {}]  }
   0x1   :  { %v32_v0 = vld [vmem:[%s791_s0 + $0x10] sm:$0xff]  ;;  %v30_v1 = vld [vmem:[%s791_s0] sm:$0xff]  ;;  %584 = vset.pattern.permute.xlu1 %v621_v2  ;;  %583 = vset.pattern.permute.xlu0 %v621_v2  ;;  %v33_v3 = vld [vmem:[%s791_s0 + $0x18] sm:$0xff] }
   0x2   :  { %45 = vperm.xlu1 %584, %v32_v0   ;;  %39 = vperm.xlu0 %583, %v30_v1   ;;  %v31_v4 = vld [vmem:[%s791_s0 + $0x8] sm:$0xff]  ;;  %v585_v5 = vld [vmem:[%s792_s1] sm:$0xff]   ;;  %v587_v9 = vld [vmem:[%s792_s1 + $0x10] sm:$0xff]  }
   0x3   :  { %v586_v6 = vld [vmem:[%s792_s1 + $0x8] sm:$0xff]   ;;  %540 = vmatprep.subr.bf16.mxu0 %v585_v5  ;;  %v34_v8 = vld [vmem:[%s791_s0 + $0x20] sm:$0xff]  ;;  %v37_v10 = vld [vmem:[%s791_s0 + $0x38] sm:$0xff] }
   0x4   :  { %v35_v7 = vld [vmem:[%s791_s0 + $0x28] sm:$0xff]  ;;  %541 = vmatpush3.bf16.msra.mxu0 %v585_v5  ;;  %v36_v11 = vld [vmem:[%s791_s0 + $0x30] sm:$0xff]  ;;  %v588_v12 = vld [vmem:[%s792_s1 + $0x18] ss:$0 sps:$4 sm:$0x11]  }
   0x5   :  { %542 = vmatprep.subr.bf16.mxu0 %v586_v6 }
   0x6   :  { %48 = vperm.xlu1 %584, %v33_v3   ;;  %42 = vperm.xlu0 %583, %v31_v4  }
   0x8   :  { %543 = vmatpush3.bf16.msra.mxu0 %v586_v6 }
   0x9   :  { %544 = vmatprep.subr.bf16.mxu0 %v587_v9 }
   0xa   :  { %54 = vperm.xlu1 %584, %v35_v7   ;;  %51 = vperm.xlu0 %583, %v34_v8  }
   0xb   :  { %12 = vsyncpa [#allocation3], 0  ;;  %vm131_vm0 = vcmask 1040384   ;;  %v28_v14 = vlaneseq  ;;  %vm118_vm5 = vcmask 408576   ;;  %v622_v20 = vmov 0.0   ;;  %v589_v37 = vld [vmem:[%s793_s2] sm:$0xff]  }
   0xc   :  { %545 = vmatpush3.bf16.msra.mxu0 %v587_v9  ;;  %v133_v13 = vsel %vm131_vm0, %v588_v12, 0  ;;  %v590_v38 = vld [vmem:[%s793_s2 + $0x8] sm:$0xff]   ;;  %556 = vmatprep.subr.bf16.mxu1 %v589_v37  ;;  %v591_v39 = vld [vmem:[%s793_s2 + $0x10] sm:$0xff]   ;;  %v592_v40 = vld [vmem:[%s793_s2 + $0x18] sm:$0xff]   ;;  %vm237_vm10 = vcmask 1046528   ;;  %s623_s16 = smov 64  }
   0xd   :  { %576 = vmatprep.subr.msk.bf16.mxu0 %vm131_vm0, %v588_v12  ;;  %v704_v15 = vand.u32 127, %v28_v14  ;;  %557 = vmatpush3.bf16.msra.mxu1 %v589_v37  ;;  %v593_v41 = vld [vmem:[%s793_s2 + $0x20] sm:$0xff]   ;;  %v594_v42 = vld [vmem:[%s793_s2 + $0x28] sm:$0xff]   ;;  %v595_v48 = vld [vmem:[%s793_s2 + $0x30] sm:$0xff]   ;;  %vm204_vm11 = vsmask.f32 7424 }
   0xe   :  { %60 = vperm.xlu1 %584, %v37_v10   ;;  %57 = vperm.xlu0 %583, %v36_v11   ;;  %v596_v58 = vld [vmem:[%s793_s2 + $0x38] sm:$0xff]   ;;  %vm248_vm12 = vsmask.f32 6400  ;;  %s624_s2 = smov 32   ;;  %s625_s17 = smov 96   ;;  %vm271_vm13 = vcmask 261120  }
   0xf   :  { %558 = vmatprep.subr.bf16.mxu1 %v590_v38  ;;  %vm276_vm14 = vcmask 523264   ;;  %vm281_vm15 = vcmask 785408   ;;  %vm420_vm0 = vcmask 130048  }
  0x10   :  { %547 = vmatpush3.bf16.msra.mxu0 %v133_v13 }
  0x11   :  { %559 = vmatpush3.bf16.msra.mxu1 %v590_v38 }
  0x12   :  { %560 = vmatprep.subr.bf16.mxu1 %v591_v39 }
  0x15   :  { %561 = vmatpush3.bf16.msra.mxu1 %v591_v39 }
  0x16   :  { %562 = vmatprep.subr.bf16.mxu1 %v592_v40 }
  0x19   :  { %563 = vmatpush3.bf16.msra.mxu1 %v592_v40 }
  0x1a   :  { %564 = vmatprep.subr.bf16.mxu1 %v593_v41 }
  0x1d   :  { %565 = vmatpush3.bf16.msra.mxu1 %v593_v41 }
  0x1e   :  { %566 = vmatprep.subr.bf16.mxu1 %v594_v42 }
  0x21   :  { %567 = vmatpush3.bf16.msra.mxu1 %v594_v42 }
  0x22   :  { %568 = vmatprep.subr.bf16.mxu1 %v595_v48 }
  0x25   :  { %569 = vmatpush3.bf16.msra.mxu1 %v595_v48  ;;  %v408_v48 = vld [vmem:[%s795_s4] sm:$0xff] }
  0x26   :  { %570 = vmatprep.subr.bf16.mxu1 %v596_v58 }
  0x29   :  { %571 = vmatpush3.bf16.msra.mxu1 %v596_v58 }
  0x81   :  { %v46_v16 = vpop.permute.xlu1 %45  ;;  %v40_v17 = vpop.permute.xlu0 %39 }
  0x82   :  { %vm64_vm1 = vcmp.eq.s32.totalorder %v46_v16, %v704_v15  ;;  %vm62_vm2 = vcmp.eq.s32.totalorder %v40_v17, %v704_v15 }
  0x83   :  { %v498_v21 = vsel %vm64_vm1, 1.0, %v622_v20  ;;  %v496_v22 = vsel %vm62_vm2, 1.0, %v622_v20  ;;  %vm442_vm1 = vcmask 124928   ;;  %vm477_vm2 = vcmask 1041409  }
  0x85   :  { %v49_v18 = vpop.permute.xlu1 %48  ;;  %v43_v19 = vpop.permute.xlu0 %42 }
  0x86   :  { %vm65_vm3 = vcmp.eq.s32.totalorder %v49_v18, %v704_v15  ;;  %vm63_vm4 = vcmp.eq.s32.totalorder %v43_v19, %v704_v15 }
  0x87   :  { %v499_v23 = vsel %vm65_vm3, 1.0, %v622_v20  ;;  %v497_v24 = vsel %vm63_vm4, 1.0, %v622_v20  ;;  %vm480_vm3 = vcmask 17408  }
  0x88   :  { %v87_v25 = vpack.c.bf16 %v499_v23, %v498_v21  ;;  %v86_v26 = vpack.c.bf16 %v497_v24, %v496_v22 }
  0x89   :  { %v55_v27 = vpop.permute.xlu1 %54  ;;  %v52_v28 = vpop.permute.xlu0 %51 }
  0x8a   :  { %vm67_vm6 = vcmp.eq.s32.totalorder %v55_v27, %v704_v15  ;;  %vm66_vm7 = vcmp.eq.s32.totalorder %v52_v28, %v704_v15  ;;  %548 = vmatprep.mubr.msk.bf16.mxu0 %vm118_vm5, %v86_v26 }
  0x8b   :  { %v501_v29 = vsel %vm67_vm6, 1.0, %v622_v20  ;;  %v500_v30 = vsel %vm66_vm7, 1.0, %v622_v20  ;;  %549 = vmatmul.mubr.msk.bf16.vlgmr.msra.gmra.mrb[0].mxu0 %vm118_vm5, %v87_v25 }
  0x8c   :  { %v88_v31 = vpack.c.bf16 %v501_v29, %v500_v30 }
  0x8d   :  { %v61_v32 = vpop.permute.xlu1 %60  ;;  %v58_v33 = vpop.permute.xlu0 %57 }
  0x8e   :  { %vm69_vm8 = vcmp.eq.s32.totalorder %v61_v32, %v704_v15  ;;  %vm68_vm9 = vcmp.eq.s32.totalorder %v58_v33, %v704_v15  ;;  %552 = vmatprep.mubr.msk.bf16.mxu0 %vm118_vm5, %v88_v31 }
  0x8f   :  { %v503_v34 = vsel %vm69_vm8, 1.0, %v622_v20  ;;  %v502_v35 = vsel %vm68_vm9, 1.0, %v622_v20 }
  0x90   :  { %v89_v36 = vpack.c.bf16 %v503_v34, %v502_v35 }
  0x93   :  { %553 = vmatmul.mubr.msk.bf16.gmra.mrb[4].mxu0 %vm118_vm5, %v89_v36 }
 0x15e   :  { %v550_v43 = vpop.f32.mrb[0].mxu0 }
 0x15f   :  { %v169_v44 = vpop.f32.mrb[1].mxu0 }
 0x160   :  { %v551_v45 = vpop.f32.mrb[2].mxu0 }
 0x161   :  { %v201_v46 = vpack.c.bf16 %v551_v45, %v550_v43  ;;  %v172_v47 = vpop.f32.mrb[3].mxu0  ;;  %v512_v43 = vld [vmem:[%s794_s3] ss:$0 sm:$0xff]  ;;  %v410_v45 = vld [vmem:[%s795_s4 + $0x10] sm:$0xff] }
 0x162   :  { %v739_v49 = vpack.c.bf16 %v172_v47, %v169_v44 }
 0x163   :  { %v213_v50 = vshll.u32 %v201_v46, 16  ;;  %v239_v51 = vrot.slane %v201_v46, 1  ;;  %v252_v52 = vshrl.u32 %v201_v46, 16 }
 0x164   :  { %v208_v53 = vshll.u32 %v739_v49, 16  ;;  %v238_v54 = vrot.slane %v739_v49, 1  ;;  %v206_v55 = vshrl.u32 %v739_v49, 16 }
 0x165   :  { %v254_v56 = vrot.slane %v252_v52, 1  ;;  %v255_v57 = vrot.slane %v213_v50, 2  ;;  %v215_v3 = vrot.slane %v213_v50, 1 }
 0x166   :  { %v554_v59 = vpop.f32.mrb[4].mxu0  ;;  %v240_v60 = vsel %vm237_vm10, %v238_v54, %v239_v51  ;;  %v210_v61 = vrot.slane %v208_v53, 1  ;;  %v249_v62 = vrot.slane %v206_v55, 1  ;;  %v250_v63 = vrot.slane %v208_v53, 2  ;;  %v411_v51 = vld [vmem:[%s795_s4 + $0x18] sm:$0xff] }
 0x167   :  { %244 = vrot.lane.b32.xlu0 %v240_v60, %s623_s16  ;;  %v185_v0 = vpop.f32.mrb[5].mxu0  ;;  %v256_v7 = vor.u32 %v255_v57, %v254_v56 }
 0x168   :  { %v555_v1 = vpop.f32.mrb[6].mxu0  ;;  %v211_v2 = vor.u32 %v210_v61, %v206_v55  ;;  %v251_v6 = vor.u32 %v250_v63, %v249_v62  ;;  %v409_v55 = vld [vmem:[%s795_s4 + $0x8] sm:$0xff] }
 0x169   :  { %v203_v4 = vpack.c.bf16 %v555_v1, %v554_v59  ;;  %v188_v5 = vpop.f32.mrb[7].mxu0 }
 0x16a   :  { %v202_v8 = vpack.c.bf16 %v188_v5, %v185_v0  ;;  %v216_v9 = vsel %vm204_vm11, %v211_v2, %v215_v3  ;;  %v257_v20 = vsel %vm248_vm12, %v251_v6, %v256_v7 }
 0x16b   :  { %v225_v10 = vshll.u32 %v203_v4, 16  ;;  %v242_v11 = vrot.slane %v203_v4, 1  ;;  %v261_v12 = vshrl.u32 %v203_v4, 16  ;;  %229 = vrot.lane.b32.xlu0 %v216_v9, %s624_s2 }
 0x16c   :  { %v220_v13 = vshll.u32 %v202_v8, 16  ;;  %v241_v16 = vrot.slane %v202_v8, 1  ;;  %v218_v17 = vshrl.u32 %v202_v8, 16 }
 0x16d   :  { %v263_v18 = vrot.slane %v261_v12, 1  ;;  %v264_v19 = vrot.slane %v225_v10, 2  ;;  %v227_v26 = vrot.slane %v225_v10, 1 }
 0x16e   :  { %v243_v21 = vsel %vm237_vm10, %v241_v16, %v242_v11  ;;  %v222_v22 = vrot.slane %v220_v13, 1  ;;  %v258_v23 = vrot.slane %v218_v17, 1  ;;  %v259_v24 = vrot.slane %v220_v13, 2 }
 0x16f   :  { %267 = vrot.lane.b32.xlu0 %v257_v20, %s625_s17  ;;  %246 = vrot.lane.b32.xlu1 %v243_v21, %s623_s16  ;;  %v265_v29 = vor.u32 %v264_v19, %v263_v18 }
 0x170   :  { %v223_v25 = vor.u32 %v222_v22, %v218_v17  ;;  %v260_v28 = vor.u32 %v259_v24, %v258_v23  ;;  %v439_v17 = vld [vmem:[%s796_s5] sm:$0x7]  ;;  %s626_s5 = smov [#allocation2]  }
 0x171   :  { %s488_s28 = sshll.u32 %s626_s5, 4  ;;  %s489_s28 = int_to_ptr.vmem [resolvable:$true] %s488_s28 }
 0x172   :  { %v228_v27 = vsel %vm204_vm11, %v223_v25, %v227_v26  ;;  %v266_v30 = vsel %vm248_vm12, %v260_v28, %v265_v29  ;;  %v521_v25 = vld [vmem:[%s797_s6] ss:$0 sm:$0xff]  ;;  %s597_s6 = scalar_lea.vmem %s489_s28, 32  ;;  %p602_p1 = scmp.lt.s32.totalorder %s489_s28, %s489_s28 }
 0x173   :  { %231 = vrot.lane.b32.xlu1 %v228_v27, %s624_s2  ;;  %p598_p0 = scmp.ne.s32.totalorder %s489_s28, %s597_s6  ;;  %p603_p2 = scmp.lt.s32.totalorder %s597_s6, %s597_s6 }
 0x175   :  { %p604_p3 = por %p603_p2, %p602_p1 }
 0x177   :  { %269 = vrot.lane.b32.xlu1 %v266_v30, %s625_s17  ;;  %p605_p4 = pnand %p604_p3, %p598_p0 }
 0x1d9   :  { %v245_v31 = vpop.permute.xlu0 %244 }
 0x1dd   :  { %v230_v32 = vpop.permute.xlu0 %229 }
 0x1de   :  { %v273_v33 = vsel %vm271_vm13, %v739_v49, %v230_v32 }
 0x1df   :  { %v278_v36 = vsel %vm276_vm14, %v273_v33, %v245_v31  ;;  %v470_v31 = vshrl.u32 %v28_v14, 7 }
 0x1e1   :  { %v268_v34 = vpop.permute.xlu0 %267  ;;  %v247_v35 = vpop.permute.xlu1 %246  ;;  %v471_v32 = vsub.s32 %v704_v15, %v470_v31 }
 0x1e2   :  { %v283_v37 = vsel %vm281_vm15, %v278_v36, %v268_v34 }
 0x1e3   :  { %572 = vmatprep.mubr.bf16.mxu1 %v283_v37 }
 0x1e5   :  { %v232_v38 = vpop.permute.xlu1 %231 }
 0x1e6   :  { %v275_v39 = vsel %vm271_vm13, %v202_v8, %v232_v38 }
 0x1e7   :  { %v280_v41 = vsel %vm276_vm14, %v275_v39, %v247_v35 }
 0x1e9   :  { %v270_v40 = vpop.permute.xlu1 %269 }
 0x1ea   :  { %v286_v42 = vsel %vm281_vm15, %v280_v41, %v270_v40 }
 0x1eb   :  { %573 = vmatmul.mubr.bf16.vlgmr.msra.gmra.mrb[0].mxu1 %v286_v42 }
 0x2be   :  { %v574_v44 = vpop.f32.mrb[0].mxu1 }
 0x2bf   :  { %v402_v46 = vadd.f32 %v574_v44, %v512_v43  ;;  %v393_v47 = vpop.f32.mrb[1].mxu1 }
 0x2c0   :  { %v394_v49 = vadd.f32 %v512_v43, %v393_v47  ;;  %v575_v50 = vpop.f32.mrb[2].mxu1 }
 0x2c1   :  { %v414_v52 = vadd.f32 %v410_v45, %v402_v46  ;;  %v405_v53 = vadd.f32 %v575_v50, %v512_v43  ;;  %v396_v54 = vpop.f32.mrb[3].mxu1 }
 0x2c2   :  { %v412_v56 = vadd.f32 %v408_v48, %v394_v49  ;;  %v397_v57 = vadd.f32 %v512_v43, %v396_v54 }
 0x2c3   :  { %v418_v58 = vmax.f32 %v414_v52, 0.0  ;;  %v415_v59 = vadd.f32 %v411_v51, %v405_v53 }
 0x2c4   :  { %v416_v60 = vmax.f32 %v412_v56, 0.0  ;;  %v413_v61 = vadd.f32 %v409_v55, %v397_v57 }
 0x2c5   :  { %v419_v62 = vmax.f32 %v415_v59, 0.0  ;;  %v430_v0 = vsel %vm420_vm0, %v418_v58, -inf }
 0x2c6   :  { %v417_v63 = vmax.f32 %v413_v61, 0.0  ;;  %v421_v2 = vsel %vm420_vm0, %v416_v60, -inf }
 0x2c7   :  { %v431_v1 = vsel %vm420_vm0, %v419_v62, -inf }
 0x2c8   :  { %v432_v3 = vmax.f32 %v430_v0, %v431_v1  ;;  %v422_v4 = vsel %vm420_vm0, %v417_v63, -inf }
 0x2c9   :  { %v423_v5 = vmax.f32 %v421_v2, %v422_v4 }
 0x2ca   :  { %v433_v6 = vrot.slane %v432_v3, 4 }
 0x2cb   :  { %v424_v7 = vrot.slane %v423_v5, 4 }
 0x2cc   :  { %v434_v8 = vmax.f32 %v432_v3, %v433_v6 }
 0x2cd   :  { %v425_v9 = vmax.f32 %v423_v5, %v424_v7 }
 0x2ce   :  { %v435_v10 = vrot.slane %v434_v8, 2 }
 0x2cf   :  { %v426_v11 = vrot.slane %v425_v9, 2 }
 0x2d0   :  { %v436_v12 = vmax.f32 %v434_v8, %v435_v10 }
 0x2d1   :  { %v427_v13 = vmax.f32 %v425_v9, %v426_v11 }
 0x2d2   :  { %v437_v16 = vrot.slane %v436_v12, 1 }
 0x2d3   :  { %v428_v18 = vrot.slane %v427_v13, 1 }
 0x2d4   :  { %v438_v19 = vmax.f32 %v436_v12, %v437_v16 }
 0x2d5   :  { %v429_v20 = vmax.f32 %v427_v13, %v428_v18 }
 0x2d6   :  { %v441_v21 = vmul.f32 %v439_v17, %v438_v19 }
 0x2d7   :  { %v440_v22 = vmul.f32 %v439_v17, %v429_v20 }
 0x2d8   :  { %v446_v23 = vsel %vm442_vm1, %v441_v21, 0.0 }
 0x2d9   :  { %447 = vadd.xlane.f32.xlu1 %v446_v23  ;;  %v443_v24 = vsel %vm442_vm1, %v440_v22, 0.0 }
 0x2da   :  { %444 = vadd.xlane.f32.xlu0 %v443_v24 }
 0x2f0   :  { %456 = vbcast.lane.b32.xlu0 %v521_v25, 256 }
 0x366   :  { %v448_v27 = vpop.xlane.xlu1 %447 }
 0x367   :  { %v445_v26 = vpop.xlane.xlu0 %444 }
 0x36b   :  { %v457_v28 = vpop.permute.xlu0 %456 }
 0x36c   :  { %v459_v29 = vadd.f32 %v457_v28, %v445_v26  ;;  %v460_v30 = vadd.f32 %v457_v28, %v448_v27 }
 0x36e   :  { %467 = vperm.xlu0 %583, %v460_v30   ;;  %464 = vperm.xlu1 %584, %v459_v29  }
 0x3ed   :  { %v468_v33 = vpop.permute.xlu0 %467  ;;  %v465_v34 = vpop.permute.xlu1 %464 }
 0x3ee   :  { %v476_v35 = vrot.slane %v468_v33, %v471_v32  ;;  %v472_v36 = vrot.slane %v465_v34, %v471_v32 }
 0x3f0   :  { %v478_v37 = vsel %vm477_vm2, %v476_v35, %v472_v36 }
 0x3f1   :  { %481 = vst.msk [vmem:[#allocation2] sm:$0x3] %vm480_vm3, %v478_v37 }
 0x3f2   :  { %608 = shalt.err (!%p605_p4)
}
 0x3f3   :  { %s609_s8 = scalar_lea.hbm %s798_s7, 32 }
 0x3f4   :  { %p610_p5 = scmp.ne.s32.totalorder %s798_s7, %s609_s8  ;;  %p613_p6 = scmp.lt.u32.totalorder %s609_s8, %s798_s7 }
 0x3f6   :  { %p615_p7 = pnand %p613_p6, %p610_p5 }
 0x3f8   :  { %618 = shalt.err (!%p615_p7)
}
 0x3f9   :  { %491 = dma.vmem_to_hbm [thread:$0]  %s489_s28, 32, %s798_s7, [#allocation3]  }
 0x3fa   :  { %619 = dma.done.wait [#allocation3], 32  }
 0x3fb   :  { %620 = vsyncadd [#allocation3], 4294967264 }
 0x3fc   :  { %495 = vsyncpa [#allocation3], 1 }

</bundles_post_ra>
